<compile_context>
chip_gen: v7x
topology: tpu7x:2x2x1
jax: 0.10.0
libtpu: 0.0.40
codegen_flags: <defaults>
</compile_context>

<pallas_src>
import functools

import jax
import jax.numpy as jnp
from jax.experimental import pallas as pl
from jax.experimental.pallas import tpu as pltpu

_LANE = 128      # lane width  (last dim)
_SUBLANE = 8     # sublane     (second-last dim)
_MIB = 1 << 20


def _round_up(n, m):
    return ((n + m - 1) // m) * m


def _tpu_generation():
    """Best-effort TPU generation sniff: 7 -> v7x, 6 -> v6e, 5 -> v5e/v5p."""
    try:
        kind = jax.devices()[0].device_kind.lower()
    except Exception:
        return None
    if "v7" in kind or "7x" in kind:
        return 7
    if "v6" in kind:
        return 6
    if "v5" in kind:
        return 5
    return None


def _mlp_kernel(*refs, n_layers, activation, o_dim_true):
    """Fused MLP: refs = (x, w0, b0, w1, b1, ..., out). Everything stays in VMEM."""
    x_ref = refs[0]
    o_ref = refs[-1]
    param_refs = refs[1:-1]

    h = x_ref[...].astype(jnp.float32)
    for k in range(n_layers):
        w = param_refs[2 * k][...]          # bf16 (MXU operand, pre-cast)
        b = param_refs[2 * k + 1][...]      # f32
        # bf16 x bf16 -> f32 accumulate on the MXU; elementwise work stays f32.
        h = jnp.dot(h.astype(jnp.bfloat16), w,
                    preferred_element_type=jnp.float32) + b
        if k < n_layers - 1:
            h = jnp.maximum(h, 0.0)         # ReLU between hidden layers

    if activation == "sigmoid":
        # sigmoid(x) == 0.5*(tanh(x/2)+1): single EUP tanh, no VPU divide.
        h = 0.5 * (jnp.tanh(0.5 * h) + 1.0)
    elif activation == "softmax":
        # torch.softmax(h, dim=1) on (B, F) == softmax over the last axis.
        if o_dim_true != h.shape[-1]:
            # mask zero-padded lanes so they don't pollute the row reduction
            lane = jax.lax.broadcasted_iota(jnp.int32, h.shape, dimension=1)
            h = jnp.where(lane < o_dim_true, h, -1e30)
        m = jnp.max(h, axis=-1, keepdims=True)
        e = jnp.exp(h - m)
        s = jnp.sum(e, axis=-1, keepdims=True)
        h = e / s                           # exact divide -> rows sum to 1 (f32)

    o_ref[...] = h.astype(o_ref.dtype)


def init_mlp_params(key, i_dim, o_dim, h_dims):
    """Parameter init mirroring the PyTorch module's shapes.

    PyTorch Linear weight is (out, in); we store its transpose (in, out)."""
    in_dims = [i_dim] + list(h_dims)
    out_dims = list(h_dims) + [o_dim]
    params = []
    for d_in, d_out in zip(in_dims, out_dims):
        key, kw, kb = jax.random.split(key, 3)
        bound = 1.0 / jnp.sqrt(jnp.float32(d_in))  # PyTorch default init range
        w = jax.random.uniform(kw, (d_in, d_out), jnp.float32, -bound, bound)
        b = jax.random.uniform(kb, (1, d_out), jnp.float32, -bound, bound)
        params.append((w, b))
    return params


def prepare_mlp_params(params, i_dim):
    """One-time lane padding + bf16 cast of the weights (hoisted out of forward)."""
    dims = [i_dim] + [w.shape[1] for (w, _) in params]     # true feature dims
    dims_p = [_round_up(d, _LANE) for d in dims]            # lane-dense padding
    padded = []
    for k, (w, b) in enumerate(params):
        d_in, d_out = w.shape
        w_p = (jnp.zeros((dims_p[k], dims_p[k + 1]), jnp.bfloat16)
               .at[:d_in, :d_out].set(w.astype(jnp.bfloat16)))
        b_p = (jnp.zeros((1, dims_p[k + 1]), jnp.float32)
               .at[:, :d_out].set(b.reshape(1, d_out).astype(jnp.float32)))
        padded.append((w_p, b_p))
    return {"params": padded, "dims": dims, "dims_p": dims_p}


def mlp_forward(x, params, activation=None, dropout=0.0):
    """Forward pass matching MLP.forward semantics (single fused pallas_call).

    `params` may be the raw list from init_mlp_params (padded on the fly) or,
    preferably, the dict returned by prepare_mlp_params (hoisted, reused)."""
    # TODO(synk): training-mode dropout (random masking) not implemented; with
    # the default p=0.0 / eval mode it is exactly the identity.
    assert activation in (None, "sigmoid", "softmax"), (
        f"Undefined activation: {activation}.")

    B, I = x.shape
    if not isinstance(params, dict):
        params = prepare_mlp_params(params, I)   # slow path; prepare once outside
    padded_params = params["params"]
    dims, dims_p = params["dims"], params["dims_p"]
    assert dims[0] == I, "input feature dim mismatch with prepared params"
    n_layers = len(padded_params)
    o_dim = dims[-1]

    gen = _tpu_generation()
    vmem_cap = (56 * _MIB) if gen == 7 else (100 * _MIB)   # v7x: 64 MiB/TC physical

    # Resident parameter footprint (worst case 2 buffers if Buffered(1) is
    # unavailable) and per-batch-row activation bytes (double-buffered in/out
    # tiles + intermediate activations, all f32).
    weight_bytes = sum(int(w.size) * w.dtype.itemsize + int(b.size) * b.dtype.itemsize
                       for (w, b) in padded_params)
    resident_bytes = 2 * weight_bytes
    bytes_per_row = 4 * (2 * dims_p[0] + 2 * dims_p[-1] + sum(dims_p[1:-1]))
    # TODO(synk): if resident weights alone exceed the VMEM budget (wide layers on
    # v7x), stream weight K/N tiles with pltpu.emit_pipeline instead of fusing.

    # --- batch tiling: pad batch only to a sublane multiple; pick TB near the cap
    B8 = _round_up(B, _SUBLANE)
    tb_cap = max(_SUBLANE,
                 min(512,
                     ((vmem_cap - resident_bytes - 4 * _MIB) // max(bytes_per_row, 1))
                     // _SUBLANE * _SUBLANE))
    n_steps = pl.cdiv(B8, tb_cap)
    if gen == 7 and n_steps < 2 and B8 >= 2 * _SUBLANE:
        n_steps = 2                      # keep both v7x TensorCores busy
    TB = _round_up(pl.cdiv(B8, n_steps), _SUBLANE)
    B_p = TB * n_steps                   # minimal padding (<= n_steps*8 extra rows)

    x_p = jnp.zeros((B_p, dims_p[0]), jnp.float32).at[:B, :I].set(
        x.astype(jnp.float32))

    # vmem limit from actual footprint (floor 32 MiB, per-generation ceiling)
    vmem_needed = resident_bytes + TB * bytes_per_row + 4 * _MIB
    vmem_limit = int(min(vmem_cap, max(32 * _MIB, vmem_needed)))

    kernel = functools.partial(
        _mlp_kernel, n_layers=n_layers, activation=activation, o_dim_true=o_dim)

    vmem = pltpu.MemorySpace.VMEM

    def _build(single_buffer_weights):
        def const_spec(shape):
            # Constant-index blocks: nothing to double-buffer -> single buffer.
            if single_buffer_weights and hasattr(pl, "Buffered"):
                return pl.BlockSpec(shape, lambda i: (0, 0), memory_space=vmem,
                                    pipeline_mode=pl.Buffered(1))
            return pl.BlockSpec(shape, lambda i: (0, 0), memory_space=vmem)

        in_specs = [pl.BlockSpec((TB, dims_p[0]), lambda i: (i, 0),
                                 memory_space=vmem)]
        flat_inputs = [x_p]
        for (w_p, b_p) in padded_params:
            in_specs.append(const_spec(w_p.shape))
            in_specs.append(const_spec(b_p.shape))
            flat_inputs += [w_p, b_p]
        out_spec = pl.BlockSpec((TB, dims_p[-1]), lambda i: (i, 0),
                                memory_space=vmem)

        # advisory cost estimate for XLA scheduling (flops from true dims; bytes
        # from the padded buffers actually moved, weights counted once)
        flops = 2 * B * sum(a * b for a, b in zip(dims[:-1], dims[1:]))
        transcendentals = B * o_dim if activation in ("sigmoid", "softmax") else 0
        bytes_accessed = int(x_p.size) * 4 + weight_bytes + B_p * dims_p[-1] * 4

        call = pl.pallas_call(
            kernel,
            out_shape=jax.ShapeDtypeStruct((B_p, dims_p[-1]), jnp.float32),
            grid=(n_steps,),
            in_specs=in_specs,
            out_specs=out_spec,
            compiler_params=pltpu.CompilerParams(
                dimension_semantics=("parallel",),     # shards across TCs on v7x
                vmem_limit_bytes=vmem_limit),
            cost_estimate=pl.CostEstimate(
                flops=flops,
                transcendentals=transcendentals,
                bytes_accessed=bytes_accessed),
        )
        return call, flat_inputs

    try:
        call, flat_inputs = _build(single_buffer_weights=True)
        out_p = call(*flat_inputs)
    except Exception:
        # older jax without BlockSpec.pipeline_mode / Buffered(1): default buffering
        call, flat_inputs = _build(single_buffer_weights=False)
        out_p = call(*flat_inputs)

    return out_p[:B, :o_dim].astype(x.dtype)


def _ref_forward(x, params, activation):
    """Pure-JAX f32 reference (HIGHEST precision) for correctness checks."""
    h = x.astype(jnp.float32)
    for i, (w, b) in enumerate(params):
        h = jnp.dot(h, w, precision=jax.lax.Precision.HIGHEST) + b
        if i < len(params) - 1:
            h = jnp.maximum(h, 0.0)
    if activation == "sigmoid":
        h = jax.nn.sigmoid(h)
    elif activation == "softmax":
        h = jax.nn.softmax(h, axis=1)
    return h


if __name__ == "__main__":
    key = jax.random.PRNGKey(0)
    k_in, k_params = jax.random.split(key)

    batch, i_dim, h_dims, o_dim = 8, 32, [64, 48], 16

    x = jax.random.normal(k_in, (batch, i_dim), jnp.float32)
    raw_params = init_mlp_params(k_params, i_dim, o_dim, h_dims)
    prepared = prepare_mlp_params(raw_params, i_dim)   # one-time pad + bf16 cast

    # softmax output head (matches torch.softmax(h, dim=1))
    out = mlp_forward(x, prepared, activation="softmax")
    jax.block_until_ready(out)
    assert out.shape == (batch, o_dim)
    assert jnp.allclose(jnp.sum(out, axis=1), 1.0, atol=1e-3)
    assert jnp.allclose(out, _ref_forward(x, raw_params, "softmax"),
                        atol=1e-2, rtol=1e-2)

    # sigmoid and identity heads
    out_sig = mlp_forward(x, prepared, activation="sigmoid")
    assert jnp.allclose(out_sig, _ref_forward(x, raw_params, "sigmoid"),
                        atol=1e-2, rtol=1e-2)

    out_none = mlp_forward(x, prepared, activation=None)
    assert jnp.allclose(out_none, _ref_forward(x, raw_params, None),
                        atol=3e-2, rtol=3e-2)

    jax.block_until_ready((out, out_sig, out_none))
    print("KERNEL_OK")
</pallas_src>

<mosaic_0001>
module attributes {stable_mosaic.version = 11 : i64} {
  func.func @_mlp_kernel(%arg0: i32, %arg1: memref<8x128xf32, #tpu.memory_space<vmem>>, %arg2: memref<128x128xbf16, #tpu.memory_space<vmem>>, %arg3: memref<1x128xf32, #tpu.memory_space<vmem>>, %arg4: memref<128x128xbf16, #tpu.memory_space<vmem>>, %arg5: memref<1x128xf32, #tpu.memory_space<vmem>>, %arg6: memref<128x128xbf16, #tpu.memory_space<vmem>>, %arg7: memref<1x128xf32, #tpu.memory_space<vmem>>, %arg8: memref<8x128xf32, #tpu.memory_space<vmem>>) attributes {dimension_semantics = [#tpu.dimension_semantics<parallel>], iteration_bounds = array<i64: 1>, scalar_prefetch = 0 : i64, scratch_operands = 0 : i64, tpu.core_type = #tpu.core_type<tc>, window_params = [{transform_indices = @transform_0, window_bounds = array<i64: 8, 128>}, {pipeline_mode = #tpu.pipeline_mode<synchronous>, transform_indices = @transform_1, window_bounds = array<i64: 128, 128>}, {pipeline_mode = #tpu.pipeline_mode<synchronous>, transform_indices = @transform_2, window_bounds = array<i64: 1, 128>}, {pipeline_mode = #tpu.pipeline_mode<synchronous>, transform_indices = @transform_3, window_bounds = array<i64: 128, 128>}, {pipeline_mode = #tpu.pipeline_mode<synchronous>, transform_indices = @transform_4, window_bounds = array<i64: 1, 128>}, {pipeline_mode = #tpu.pipeline_mode<synchronous>, transform_indices = @transform_5, window_bounds = array<i64: 128, 128>}, {pipeline_mode = #tpu.pipeline_mode<synchronous>, transform_indices = @transform_6, window_bounds = array<i64: 1, 128>}, {transform_indices = @transform_7, window_bounds = array<i64: 8, 128>}]} {
    %c0 = arith.constant 0 : index
    %c0_0 = arith.constant 0 : index
    %0 = vector.load %arg1[%c0, %c0_0] : memref<8x128xf32, #tpu.memory_space<vmem>>, vector<8x128xf32>
    %c0_1 = arith.constant 0 : index
    %c0_2 = arith.constant 0 : index
    %1 = vector.load %arg2[%c0_1, %c0_2] : memref<128x128xbf16, #tpu.memory_space<vmem>>, vector<128x128xbf16>
    %c0_3 = arith.constant 0 : index
    %c0_4 = arith.constant 0 : index
    %2 = vector.load %arg3[%c0_3, %c0_4] : memref<1x128xf32, #tpu.memory_space<vmem>>, vector<1x128xf32>
    %3 = arith.truncf %0 : vector<8x128xf32> to vector<8x128xbf16>
    %cst = arith.constant dense<0.000000e+00> : vector<8x128xf32>
    %4 = tpu.matmul %3, %1, %cst {dimension_numbers = #tpu.dot_dimension_numbers<[1], [0], [0], [1], [0, 0, 1, 1], [], []>} : vector<8x128xbf16>, vector<128x128xbf16>, vector<8x128xf32> -> vector<8x128xf32>
    %5 = vector.broadcast %2 : vector<1x128xf32> to vector<8x128xf32>
    %6 = arith.addf %4, %5 : vector<8x128xf32>
    %cst_5 = arith.constant 0.000000e+00 : f32
    %7 = vector.broadcast %cst_5 : f32 to vector<8x128xf32>
    %8 = arith.maximumf %6, %7 : vector<8x128xf32>
    %c0_6 = arith.constant 0 : index
    %c0_7 = arith.constant 0 : index
    %9 = vector.load %arg4[%c0_6, %c0_7] : memref<128x128xbf16, #tpu.memory_space<vmem>>, vector<128x128xbf16>
    %c0_8 = arith.constant 0 : index
    %c0_9 = arith.constant 0 : index
    %10 = vector.load %arg5[%c0_8, %c0_9] : memref<1x128xf32, #tpu.memory_space<vmem>>, vector<1x128xf32>
    %11 = arith.truncf %8 : vector<8x128xf32> to vector<8x128xbf16>
    %cst_10 = arith.constant dense<0.000000e+00> : vector<8x128xf32>
    %12 = tpu.matmul %11, %9, %cst_10 {dimension_numbers = #tpu.dot_dimension_numbers<[1], [0], [0], [1], [0, 0, 1, 1], [], []>} : vector<8x128xbf16>, vector<128x128xbf16>, vector<8x128xf32> -> vector<8x128xf32>
    %13 = vector.broadcast %10 : vector<1x128xf32> to vector<8x128xf32>
    %14 = arith.addf %12, %13 : vector<8x128xf32>
    %cst_11 = arith.constant 0.000000e+00 : f32
    %15 = vector.broadcast %cst_11 : f32 to vector<8x128xf32>
    %16 = arith.maximumf %14, %15 : vector<8x128xf32>
    %c0_12 = arith.constant 0 : index
    %c0_13 = arith.constant 0 : index
    %17 = vector.load %arg6[%c0_12, %c0_13] : memref<128x128xbf16, #tpu.memory_space<vmem>>, vector<128x128xbf16>
    %c0_14 = arith.constant 0 : index
    %c0_15 = arith.constant 0 : index
    %18 = vector.load %arg7[%c0_14, %c0_15] : memref<1x128xf32, #tpu.memory_space<vmem>>, vector<1x128xf32>
    %19 = arith.truncf %16 : vector<8x128xf32> to vector<8x128xbf16>
    %cst_16 = arith.constant dense<0.000000e+00> : vector<8x128xf32>
    %20 = tpu.matmul %19, %17, %cst_16 {dimension_numbers = #tpu.dot_dimension_numbers<[1], [0], [0], [1], [0, 0, 1, 1], [], []>} : vector<8x128xbf16>, vector<128x128xbf16>, vector<8x128xf32> -> vector<8x128xf32>
    %21 = vector.broadcast %18 : vector<1x128xf32> to vector<8x128xf32>
    %22 = arith.addf %20, %21 : vector<8x128xf32>
    %23 = tpu.iota {dimensions = array<i32: 1>} : vector<8x128xi32>
    %c16_i32 = arith.constant 16 : i32
    %24 = vector.broadcast %c16_i32 : i32 to vector<8x128xi32>
    %25 = arith.cmpi slt, %23, %24 : vector<8x128xi32>
    %cst_17 = arith.constant -1.000000e+30 : f32
    %26 = vector.broadcast %cst_17 : f32 to vector<8x128xf32>
    %27 = arith.select %25, %22, %26 : vector<8x128xi1>, vector<8x128xf32>
    %cst_18 = arith.constant dense<0xFF800000> : vector<8xf32>
    %28 = vector.multi_reduction <maximumf>, %27, %cst_18 [1] : vector<8x128xf32> to vector<8xf32>
    %29 = vector.shape_cast %28 : vector<8xf32> to vector<8x1xf32>
    %30 = vector.broadcast %29 : vector<8x1xf32> to vector<8x128xf32>
    %31 = arith.subf %27, %30 : vector<8x128xf32>
    %32 = math.exp %31 : vector<8x128xf32>
    %cst_19 = arith.constant dense<0.000000e+00> : vector<8xf32>
    %33 = vector.multi_reduction <add>, %32, %cst_19 [1] : vector<8x128xf32> to vector<8xf32>
    %34 = vector.shape_cast %33 : vector<8xf32> to vector<8x1xf32>
    %35 = vector.broadcast %34 : vector<8x1xf32> to vector<8x128xf32>
    %36 = arith.divf %32, %35 : vector<8x128xf32>
    %c0_20 = arith.constant 0 : index
    %c0_21 = arith.constant 0 : index
    %37 = vector.load %arg8[%c0_20, %c0_21] : memref<8x128xf32, #tpu.memory_space<vmem>>, vector<8x128xf32>
    tpu.vector_store %arg8[%c0_20, %c0_21], %36 {strides = array<i32>} : memref<8x128xf32, #tpu.memory_space<vmem>>, vector<8x128xf32>,
    return
  }
  func.func @transform_0(%arg0: i32) -> (i32, i32) {
    %c0_i32 = arith.constant 0 : i32
    %c0_i32_0 = arith.constant 0 : i32
    return %arg0, %c0_i32 : i32, i32
  }
  func.func @transform_1(%arg0: i32) -> (i32, i32) {
    %c0_i32 = arith.constant 0 : i32
    %c0_i32_0 = arith.constant 0 : i32
    %c0_i32_1 = arith.constant 0 : i32
    return %c0_i32, %c0_i32_0 : i32, i32
  }
  func.func @transform_2(%arg0: i32) -> (i32, i32) {
    %c0_i32 = arith.constant 0 : i32
    %c0_i32_0 = arith.constant 0 : i32
    %c0_i32_1 = arith.constant 0 : i32
    return %c0_i32, %c0_i32_0 : i32, i32
  }
  func.func @transform_3(%arg0: i32) -> (i32, i32) {
    %c0_i32 = arith.constant 0 : i32
    %c0_i32_0 = arith.constant 0 : i32
    %c0_i32_1 = arith.constant 0 : i32
    return %c0_i32, %c0_i32_0 : i32, i32
  }
  func.func @transform_4(%arg0: i32) -> (i32, i32) {
    %c0_i32 = arith.constant 0 : i32
    %c0_i32_0 = arith.constant 0 : i32
    %c0_i32_1 = arith.constant 0 : i32
    return %c0_i32, %c0_i32_0 : i32, i32
  }
  func.func @transform_5(%arg0: i32) -> (i32, i32) {
    %c0_i32 = arith.constant 0 : i32
    %c0_i32_0 = arith.constant 0 : i32
    %c0_i32_1 = arith.constant 0 : i32
    return %c0_i32, %c0_i32_0 : i32, i32
  }
  func.func @transform_6(%arg0: i32) -> (i32, i32) {
    %c0_i32 = arith.constant 0 : i32
    %c0_i32_0 = arith.constant 0 : i32
    %c0_i32_1 = arith.constant 0 : i32
    return %c0_i32, %c0_i32_0 : i32, i32
  }
  func.func @transform_7(%arg0: i32) -> (i32, i32) {
    %c0_i32 = arith.constant 0 : i32
    %c0_i32_0 = arith.constant 0 : i32
    return %arg0, %c0_i32 : i32, i32
  }
}

module attributes {stable_mosaic.version = 11 : i64} {
  func.func @_mlp_kernel(%arg0: i32, %arg1: memref<8x128xf32, #tpu.memory_space<vmem>>, %arg2: memref<128x128xbf16, #tpu.memory_space<vmem>>, %arg3: memref<1x128xf32, #tpu.memory_space<vmem>>, %arg4: memref<128x128xbf16, #tpu.memory_space<vmem>>, %arg5: memref<1x128xf32, #tpu.memory_space<vmem>>, %arg6: memref<128x128xbf16, #tpu.memory_space<vmem>>, %arg7: memref<1x128xf32, #tpu.memory_space<vmem>>, %arg8: memref<8x128xf32, #tpu.memory_space<vmem>>) attributes {dimension_semantics = [#tpu.dimension_semantics<parallel>], iteration_bounds = array<i64: 1>, scalar_prefetch = 0 : i64, scratch_operands = 0 : i64, tpu.core_type = #tpu.core_type<tc>, window_params = [{transform_indices = @transform_0, window_bounds = array<i64: 8, 128>}, {pipeline_mode = #tpu.pipeline_mode<synchronous>, transform_indices = @transform_1, window_bounds = array<i64: 128, 128>}, {pipeline_mode = #tpu.pipeline_mode<synchronous>, transform_indices = @transform_2, window_bounds = array<i64: 1, 128>}, {pipeline_mode = #tpu.pipeline_mode<synchronous>, transform_indices = @transform_3, window_bounds = array<i64: 128, 128>}, {pipeline_mode = #tpu.pipeline_mode<synchronous>, transform_indices = @transform_4, window_bounds = array<i64: 1, 128>}, {pipeline_mode = #tpu.pipeline_mode<synchronous>, transform_indices = @transform_5, window_bounds = array<i64: 128, 128>}, {pipeline_mode = #tpu.pipeline_mode<synchronous>, transform_indices = @transform_6, window_bounds = array<i64: 1, 128>}, {transform_indices = @transform_7, window_bounds = array<i64: 8, 128>}]} {
    %c0 = arith.constant 0 : index
    %c0_0 = arith.constant 0 : index
    %0 = vector.load %arg1[%c0, %c0_0] : memref<8x128xf32, #tpu.memory_space<vmem>>, vector<8x128xf32>
    %c0_1 = arith.constant 0 : index
    %c0_2 = arith.constant 0 : index
    %1 = vector.load %arg2[%c0_1, %c0_2] : memref<128x128xbf16, #tpu.memory_space<vmem>>, vector<128x128xbf16>
    %c0_3 = arith.constant 0 : index
    %c0_4 = arith.constant 0 : index
    %2 = vector.load %arg3[%c0_3, %c0_4] : memref<1x128xf32, #tpu.memory_space<vmem>>, vector<1x128xf32>
    %3 = arith.truncf %0 : vector<8x128xf32> to vector<8x128xbf16>
    %cst = arith.constant dense<0.000000e+00> : vector<8x128xf32>
    %4 = tpu.matmul %3, %1, %cst {dimension_numbers = #tpu.dot_dimension_numbers<[1], [0], [0], [1], [0, 0, 1, 1], [], []>} : vector<8x128xbf16>, vector<128x128xbf16>, vector<8x128xf32> -> vector<8x128xf32>
    %5 = vector.broadcast %2 : vector<1x128xf32> to vector<8x128xf32>
    %6 = arith.addf %4, %5 : vector<8x128xf32>
    %cst_5 = arith.constant 0.000000e+00 : f32
    %7 = vector.broadcast %cst_5 : f32 to vector<8x128xf32>
    %8 = arith.maximumf %6, %7 : vector<8x128xf32>
    %c0_6 = arith.constant 0 : index
    %c0_7 = arith.constant 0 : index
    %9 = vector.load %arg4[%c0_6, %c0_7] : memref<128x128xbf16, #tpu.memory_space<vmem>>, vector<128x128xbf16>
    %c0_8 = arith.constant 0 : index
    %c0_9 = arith.constant 0 : index
    %10 = vector.load %arg5[%c0_8, %c0_9] : memref<1x128xf32, #tpu.memory_space<vmem>>, vector<1x128xf32>
    %11 = arith.truncf %8 : vector<8x128xf32> to vector<8x128xbf16>
    %cst_10 = arith.constant dense<0.000000e+00> : vector<8x128xf32>
    %12 = tpu.matmul %11, %9, %cst_10 {dimension_numbers = #tpu.dot_dimension_numbers<[1], [0], [0], [1], [0, 0, 1, 1], [], []>} : vector<8x128xbf16>, vector<128x128xbf16>, vector<8x128xf32> -> vector<8x128xf32>
    %13 = vector.broadcast %10 : vector<1x128xf32> to vector<8x128xf32>
    %14 = arith.addf %12, %13 : vector<8x128xf32>
    %cst_11 = arith.constant 0.000000e+00 : f32
    %15 = vector.broadcast %cst_11 : f32 to vector<8x128xf32>
    %16 = arith.maximumf %14, %15 : vector<8x128xf32>
    %c0_12 = arith.constant 0 : index
    %c0_13 = arith.constant 0 : index
    %17 = vector.load %arg6[%c0_12, %c0_13] : memref<128x128xbf16, #tpu.memory_space<vmem>>, vector<128x128xbf16>
    %c0_14 = arith.constant 0 : index
    %c0_15 = arith.constant 0 : index
    %18 = vector.load %arg7[%c0_14, %c0_15] : memref<1x128xf32, #tpu.memory_space<vmem>>, vector<1x128xf32>
    %19 = arith.truncf %16 : vector<8x128xf32> to vector<8x128xbf16>
    %cst_16 = arith.constant dense<0.000000e+00> : vector<8x128xf32>
    %20 = tpu.matmul %19, %17, %cst_16 {dimension_numbers = #tpu.dot_dimension_numbers<[1], [0], [0], [1], [0, 0, 1, 1], [], []>} : vector<8x128xbf16>, vector<128x128xbf16>, vector<8x128xf32> -> vector<8x128xf32>
    %21 = vector.broadcast %18 : vector<1x128xf32> to vector<8x128xf32>
    %22 = arith.addf %20, %21 : vector<8x128xf32>
    %23 = tpu.iota {dimensions = array<i32: 1>} : vector<8x128xi32>
    %c16_i32 = arith.constant 16 : i32
    %24 = vector.broadcast %c16_i32 : i32 to vector<8x128xi32>
    %25 = arith.cmpi slt, %23, %24 : vector<8x128xi32>
    %cst_17 = arith.constant -1.000000e+30 : f32
    %26 = vector.broadcast %cst_17 : f32 to vector<8x128xf32>
    %27 = arith.select %25, %22, %26 : vector<8x128xi1>, vector<8x128xf32>
    %cst_18 = arith.constant dense<0xFF800000> : vector<8xf32>
    %28 = vector.multi_reduction <maximumf>, %27, %cst_18 [1] : vector<8x128xf32> to vector<8xf32>
    %29 = vector.shape_cast %28 : vector<8xf32> to vector<8x1xf32>
    %30 = vector.broadcast %29 : vector<8x1xf32> to vector<8x128xf32>
    %31 = arith.subf %27, %30 : vector<8x128xf32>
    %32 = math.exp %31 : vector<8x128xf32>
    %cst_19 = arith.constant dense<0.000000e+00> : vector<8xf32>
    %33 = vector.multi_reduction <add>, %32, %cst_19 [1] : vector<8x128xf32> to vector<8xf32>
    %34 = vector.shape_cast %33 : vector<8xf32> to vector<8x1xf32>
    %35 = vector.broadcast %34 : vector<8x1xf32> to vector<8x128xf32>
    %36 = arith.divf %32, %35 : vector<8x128xf32>
    %c0_20 = arith.constant 0 : index
    %c0_21 = arith.constant 0 : index
    %37 = vector.load %arg8[%c0_20, %c0_21] : memref<8x128xf32, #tpu.memory_space<vmem>>, vector<8x128xf32>
    tpu.vector_store %arg8[%c0_20, %c0_21], %36 {strides = array<i32>} : memref<8x128xf32, #tpu.memory_space<vmem>>, vector<8x128xf32>,
    return
  }
  func.func @transform_0(%arg0: i32) -> (i32, i32) {
    %c0_i32 = arith.constant 0 : i32
    %c0_i32_0 = arith.constant 0 : i32
    return %arg0, %c0_i32 : i32, i32
  }
  func.func @transform_1(%arg0: i32) -> (i32, i32) {
    %c0_i32 = arith.constant 0 : i32
    %c0_i32_0 = arith.constant 0 : i32
    %c0_i32_1 = arith.constant 0 : i32
    return %c0_i32, %c0_i32_0 : i32, i32
  }
  func.func @transform_2(%arg0: i32) -> (i32, i32) {
    %c0_i32 = arith.constant 0 : i32
    %c0_i32_0 = arith.constant 0 : i32
    %c0_i32_1 = arith.constant 0 : i32
    return %c0_i32, %c0_i32_0 : i32, i32
  }
  func.func @transform_3(%arg0: i32) -> (i32, i32) {
    %c0_i32 = arith.constant 0 : i32
    %c0_i32_0 = arith.constant 0 : i32
    %c0_i32_1 = arith.constant 0 : i32
    return %c0_i32, %c0_i32_0 : i32, i32
  }
  func.func @transform_4(%arg0: i32) -> (i32, i32) {
    %c0_i32 = arith.constant 0 : i32
    %c0_i32_0 = arith.constant 0 : i32
    %c0_i32_1 = arith.constant 0 : i32
    return %c0_i32, %c0_i32_0 : i32, i32
  }
  func.func @transform_5(%arg0: i32) -> (i32, i32) {
    %c0_i32 = arith.constant 0 : i32
    %c0_i32_0 = arith.constant 0 : i32
    %c0_i32_1 = arith.constant 0 : i32
    return %c0_i32, %c0_i32_0 : i32, i32
  }
  func.func @transform_6(%arg0: i32) -> (i32, i32) {
    %c0_i32 = arith.constant 0 : i32
    %c0_i32_0 = arith.constant 0 : i32
    %c0_i32_1 = arith.constant 0 : i32
    return %c0_i32, %c0_i32_0 : i32, i32
  }
  func.func @transform_7(%arg0: i32) -> (i32, i32) {
    %c0_i32 = arith.constant 0 : i32
    %c0_i32_0 = arith.constant 0 : i32
    return %arg0, %c0_i32 : i32, i32
  }
}

</mosaic_0001>

<bundles_post_ra>
// kernel: tpu_custom_call.1
= control target key start
LH: loop header
LB: loop body
LE: loop exit
PB: predicated region body
PF: predicated region fallthrough
CT: control target
= control target key end

     0   :  { %12 = vsyncpa [#allocation3], 0  ;;  %s877_s0 = inlined_call_operand.hbm [shape: f32[8,128], index: 0, kind: input, shape index: {}]   ;;  %s878_s1 = inlined_call_operand.hbm [shape: bf16[128,128], index: 1, kind: input, shape index: {}]   ;;  %s879_s2 = inlined_call_operand.vmem [shape: f32[1,128], index: 2, kind: input, shape index: {}]   ;;  %s880_s3 = inlined_call_operand.hbm [shape: bf16[128,128], index: 3, kind: input, shape index: {}]   ;;  %s881_s4 = inlined_call_operand.vmem [shape: f32[1,128], index: 4, kind: input, shape index: {}]   ;;  %s882_s5 = inlined_call_operand.hbm [shape: bf16[128,128], index: 5, kind: input, shape index: {}]   ;;  %s883_s6 = inlined_call_operand.vmem [shape: f32[1,128], index: 6, kind: input, shape index: {}]   ;;  %s884_s7 = inlined_call_operand.hbm [shape: f32[8,128], index: 7, kind: output, shape index: {}]  }
   0x1   :  { %13 = vsyncpa [#allocation6], 0 }
   0x2   :  { %14 = vsyncpa [#allocation9], 0 }
   0x3   :  { %15 = vsyncpa [#allocation4], 0  ;;  %s720_s24 = smov [#allocation5]   ;;  %s602_s28 = scalar_lea.hbm %s878_s1, 1024 }
   0x4   :  { %s31_s25 = sshll.u32 %s720_s24, 4  ;;  %p603_p0 = scmp.ne.s32.totalorder %s878_s1, %s602_s28  ;;  %s32_s25 = int_to_ptr.vmem [resolvable:$true] %s31_s25 }
   0x5   :  { %p606_p1 = scmp.lt.u32.totalorder %s602_s28, %s878_s1 }
   0x7   :  { %p608_p2 = pnand %p606_p1, %p603_p0 }
   0x9   :  { %611 = shalt.err (!%p608_p2)
}
   0xa   :  { %s612_s10 = scalar_lea.vmem %s32_s25, 1024  ;;  %p617_p4 = scmp.lt.s32.totalorder %s32_s25, %s32_s25 }
   0xb   :  { %p613_p3 = scmp.ne.s32.totalorder %s32_s25, %s612_s10  ;;  %p618_p5 = scmp.lt.s32.totalorder %s612_s10, %s612_s10 }
   0xd   :  { %p619_p6 = por %p618_p5, %p617_p4 }
   0xf   :  { %p620_p7 = pnand %p619_p6, %p613_p3 }
  0x11   :  { %623 = shalt.err (!%p620_p7)
}
  0x12   :  { %s721_s11 = smov 64   ;;  %s722_s12 = smov 4  }
  0x13   :  { %37 = dma.hbm_to_vmem [thread:$0]  %s878_s1, 1024, %s32_s25, [#allocation6], %s721_s11, %s721_s11, %s722_s12  }
  0x14   :  { %s723_s15 = smov [#allocation2]   ;;  %s724_s17 = smov [#allocation7]  }
  0x15   :  { %s22_s16 = sshll.u32 %s723_s15, 4  ;;  %s45_s18 = sshll.u32 %s724_s17, 4  ;;  %s23_s16 = int_to_ptr.vmem [resolvable:$true] %s22_s16  ;;  %s46_s18 = int_to_ptr.vmem [resolvable:$true] %s45_s18 }
  0x16   :  { %s624_s21 = scalar_lea.hbm %s877_s0, 128 }
  0x17   :  { %p625_p8 = scmp.ne.s32.totalorder %s877_s0, %s624_s21  ;;  %p628_p9 = scmp.lt.u32.totalorder %s624_s21, %s877_s0 }
  0x19   :  { %p630_p10 = pnand %p628_p9, %p625_p8 }
  0x1b   :  { %633 = shalt.err (!%p630_p10)
}
  0x1c   :  { %s634_s1 = scalar_lea.vmem %s23_s16, 128  ;;  %p639_p12 = scmp.lt.s32.totalorder %s23_s16, %s23_s16 }
  0x1d   :  { %p635_p11 = scmp.ne.s32.totalorder %s23_s16, %s634_s1  ;;  %p640_p13 = scmp.lt.s32.totalorder %s634_s1, %s634_s1 }
  0x1f   :  { %p641_p0 = por %p640_p13, %p639_p12 }
  0x21   :  { %p642_p1 = pnand %p641_p0, %p635_p11 }
  0x23   :  { %645 = shalt.err (!%p642_p1)
}
  0x24   :  { %25 = dma.hbm_to_vmem [thread:$0]  %s877_s0, 128, %s23_s16, [#allocation3]  }
  0x25   :  { %s646_s30 = scalar_lea.hbm %s880_s3, 1024 }
  0x26   :  { %p647_p2 = scmp.ne.s32.totalorder %s880_s3, %s646_s30  ;;  %p650_p3 = scmp.lt.u32.totalorder %s646_s30, %s880_s3 }
  0x28   :  { %p652_p4 = pnand %p650_p3, %p647_p2 }
  0x2a   :  { %655 = shalt.err (!%p652_p4)
}
  0x2b   :  { %s656_s14 = scalar_lea.vmem %s46_s18, 1024  ;;  %p661_p6 = scmp.lt.s32.totalorder %s46_s18, %s46_s18 }
  0x2c   :  { %p657_p5 = scmp.ne.s32.totalorder %s46_s18, %s656_s14  ;;  %p662_p7 = scmp.lt.s32.totalorder %s656_s14, %s656_s14 }
  0x2e   :  { %p663_p8 = por %p662_p7, %p661_p6 }
  0x30   :  { %p664_p9 = pnand %p663_p8, %p657_p5 }
  0x32   :  { %667 = shalt.err (!%p664_p9)
}
  0x33   :  { %51 = dma.hbm_to_vmem [thread:$0]  %s880_s3, 1024, %s46_s18, [#allocation6], %s721_s11, %s721_s11, %s722_s12  }
  0x34   :  { %s725_s16 = smov [#allocation8]   ;;  %s668_s21 = scalar_lea.hbm %s882_s5, 1024 }
  0x35   :  { %s59_s17 = sshll.u32 %s725_s16, 4  ;;  %p669_p10 = scmp.ne.s32.totalorder %s882_s5, %s668_s21  ;;  %s60_s17 = int_to_ptr.vmem [resolvable:$true] %s59_s17 }
  0x36   :  { %p672_p11 = scmp.lt.u32.totalorder %s668_s21, %s882_s5 }
  0x38   :  { %p674_p12 = pnand %p672_p11, %p669_p10 }
  0x3a   :  { %677 = shalt.err (!%p674_p12)
}
  0x3b   :  { %s678_s1 = scalar_lea.vmem %s60_s17, 1024  ;;  %p683_p0 = scmp.lt.s32.totalorder %s60_s17, %s60_s17 }
  0x3c   :  { %p679_p13 = scmp.ne.s32.totalorder %s60_s17, %s678_s1  ;;  %p684_p1 = scmp.lt.s32.totalorder %s678_s1, %s678_s1 }
  0x3e   :  { %p685_p2 = por %p684_p1, %p683_p0 }
  0x40   :  { %p686_p3 = pnand %p685_p2, %p679_p13 }
  0x42   :  { %689 = shalt.err (!%p686_p3)
}
  0x43   :  { %65 = dma.hbm_to_vmem [thread:$0]  %s882_s5, 1024, %s60_s17, [#allocation9], %s721_s11, %s721_s11, %s722_s12  }
  0x44   :  { %712 = dma.done.wait [#allocation3], 128  }
  0x45   :  { %713 = vsyncadd [#allocation3], 4294967168 }
  0x46   :  { %714 = dma.done.wait [#allocation6], 2048  }
  0x47   :  { %715 = vsyncadd [#allocation6], 4294965248 }
  0x48   :  { %716 = dma.done.wait [#allocation9], 1024  }
  0x49   :  { %717 = vsyncadd [#allocation9], 4294966272  ;;  %v726_v0 = vmov 0.0   ;;  %vm727_vm0 = vmmov 0   ;;  %v574_v1 = vld [vmem:[#allocation5] sm:$0xff]   ;;  %v575_v2 = vld [vmem:[#allocation5 + $0x8] sm:$0xff]   ;;  %v420_v43 = vlaneseq }
  0x4a   :  { %505 = vmatprep.subr.bf16.mxu0 %v726_v0  ;;  %521 = vmatprep.mubr.msk.bf16.mxu0 %vm727_vm0, %v726_v0  ;;  %v576_v3 = vld [vmem:[#allocation5 + $0x10] sm:$0xff]   ;;  %v582_v4 = vld [vmem:[#allocation7] sm:$0xff]   ;;  %v577_v5 = vld [vmem:[#allocation5 + $0x18] sm:$0xff]  }
  0x4b   :  { %525 = vmatprep.subr.bf16.mxu1 %v726_v0  ;;  %541 = vmatprep.mubr.msk.bf16.mxu1 %vm727_vm0, %v726_v0  ;;  %v583_v6 = vld [vmem:[#allocation7 + $0x8] sm:$0xff]   ;;  %v578_v7 = vld [vmem:[#allocation5 + $0x20] sm:$0xff]   ;;  %v584_v8 = vld [vmem:[#allocation7 + $0x10] sm:$0xff]   ;;  %v421_v44 = vand.u32 127, %v420_v43 }
  0x4c   :  { %506 = vmatpush3.bf16.msra.mxu0 %v574_v1  ;;  %526 = vmatpush3.bf16.msra.mxu1 %v582_v4  ;;  %v579_v9 = vld [vmem:[#allocation5 + $0x28] sm:$0xff]   ;;  %v585_v10 = vld [vmem:[#allocation7 + $0x18] sm:$0xff]   ;;  %v580_v11 = vld [vmem:[#allocation5 + $0x30] sm:$0xff]  }
  0x4d   :  { %507 = vmatprep.subr.bf16.mxu0 %v726_v0  ;;  %527 = vmatprep.subr.bf16.mxu1 %v726_v0  ;;  %v586_v12 = vld [vmem:[#allocation7 + $0x20] sm:$0xff]   ;;  %v581_v13 = vld [vmem:[#allocation5 + $0x38] sm:$0xff]   ;;  %v587_v15 = vld [vmem:[#allocation7 + $0x28] sm:$0xff]   ;;  %vm422_vm1 = vcmp.lt.s32.totalorder %v421_v44, 16 }
  0x4e   :  { %v81_v14 = vld [vmem:[#allocation2] sm:$0xff]  ;;  %v588_v17 = vld [vmem:[#allocation7 + $0x30] sm:$0xff]   ;;  %v590_v19 = vld [vmem:[#allocation8] sm:$0xff]  }
  0x4f   :  { %v99_v16 = vpack.c.bf16 %v81_v14, %v81_v14  ;;  %v589_v18 = vld [vmem:[#allocation7 + $0x38] sm:$0xff]   ;;  %v591_v20 = vld [vmem:[#allocation8 + $0x8] sm:$0xff]   ;;  %v592_v21 = vld [vmem:[#allocation8 + $0x10] sm:$0xff]  }
  0x50   :  { %508 = vmatpush3.bf16.msra.mxu0 %v575_v2  ;;  %528 = vmatpush3.bf16.msra.mxu1 %v583_v6  ;;  %v593_v22 = vld [vmem:[#allocation8 + $0x18] sm:$0xff]   ;;  %v594_v23 = vld [vmem:[#allocation8 + $0x20] sm:$0xff]   ;;  %v595_v24 = vld [vmem:[#allocation8 + $0x28] sm:$0xff]  }
  0x51   :  { %509 = vmatprep.subr.bf16.mxu0 %v726_v0  ;;  %529 = vmatprep.subr.bf16.mxu1 %v726_v0  ;;  %v451_v25 = vld [vmem:[%s879_s2] ss:$0 sm:$0xff]  ;;  %v596_v33 = vld [vmem:[#allocation8 + $0x30] sm:$0xff]  }
  0x52   :  { %v597_v34 = vld [vmem:[#allocation8 + $0x38] sm:$0xff]  }
  0x53   :  { %v460_v35 = vld [vmem:[%s881_s4] ss:$0 sm:$0xff]  ;;  %s728_s4 = smov [#allocation10]  }
  0x54   :  { %510 = vmatpush3.bf16.msra.mxu0 %v576_v3  ;;  %530 = vmatpush3.bf16.msra.mxu1 %v584_v8  ;;  %v469_v45 = vld [vmem:[%s883_s6] ss:$0 sm:$0xff]  ;;  %s440_s28 = sshll.u32 %s728_s4, 4  ;;  %s441_s28 = int_to_ptr.vmem [resolvable:$true] %s440_s28 }
  0x55   :  { %511 = vmatprep.subr.bf16.mxu0 %v726_v0  ;;  %531 = vmatprep.subr.bf16.mxu1 %v726_v0  ;;  %s690_s6 = scalar_lea.vmem %s441_s28, 128  ;;  %p695_p5 = scmp.lt.s32.totalorder %s441_s28, %s441_s28 }
  0x56   :  { %p691_p4 = scmp.ne.s32.totalorder %s441_s28, %s690_s6  ;;  %p696_p6 = scmp.lt.s32.totalorder %s690_s6, %s690_s6 }
  0x58   :  { %512 = vmatpush3.bf16.msra.mxu0 %v577_v5  ;;  %532 = vmatpush3.bf16.msra.mxu1 %v585_v10  ;;  %p697_p7 = por %p696_p6, %p695_p5 }
  0x59   :  { %513 = vmatprep.subr.bf16.mxu0 %v726_v0  ;;  %533 = vmatprep.subr.bf16.mxu1 %v726_v0 }
  0x5a   :  { %p698_p8 = pnand %p697_p7, %p691_p4 }
  0x5c   :  { %514 = vmatpush3.bf16.msra.mxu0 %v578_v7  ;;  %534 = vmatpush3.bf16.msra.mxu1 %v586_v12 }
  0x5d   :  { %515 = vmatprep.subr.bf16.mxu0 %v726_v0  ;;  %535 = vmatprep.subr.bf16.mxu1 %v726_v0 }
  0x60   :  { %516 = vmatpush3.bf16.msra.mxu0 %v579_v9  ;;  %536 = vmatpush3.bf16.msra.mxu1 %v587_v15 }
  0x61   :  { %517 = vmatprep.subr.bf16.mxu0 %v726_v0  ;;  %537 = vmatprep.subr.bf16.mxu1 %v726_v0 }
  0x64   :  { %518 = vmatpush3.bf16.msra.mxu0 %v580_v11  ;;  %538 = vmatpush3.bf16.msra.mxu1 %v588_v17 }
  0x65   :  { %519 = vmatprep.subr.bf16.mxu0 %v726_v0  ;;  %539 = vmatprep.subr.bf16.mxu1 %v726_v0 }
  0x68   :  { %520 = vmatpush3.bf16.msra.mxu0 %v581_v13  ;;  %540 = vmatpush3.bf16.msra.mxu1 %v589_v18 }
  0x69   :  { %545 = vmatprep.subr.bf16.mxu0 %v726_v0 }
  0x6b   :  { %522 = vmatmul.mubr.bf16.vlgmr.msra.gmra.mrb[0].mxu0 %v99_v16 }
  0x6c   :  { %561 = vmatprep.mubr.msk.bf16.mxu0 %vm727_vm0, %v726_v0  ;;  %546 = vmatpush3.bf16.msra.mxu0 %v590_v19 }
  0x6d   :  { %547 = vmatprep.subr.bf16.mxu0 %v726_v0 }
  0x70   :  { %548 = vmatpush3.bf16.msra.mxu0 %v591_v20 }
  0x71   :  { %549 = vmatprep.subr.bf16.mxu0 %v726_v0 }
  0x74   :  { %550 = vmatpush3.bf16.msra.mxu0 %v592_v21 }
  0x75   :  { %551 = vmatprep.subr.bf16.mxu0 %v726_v0 }
  0x78   :  { %552 = vmatpush3.bf16.msra.mxu0 %v593_v22 }
  0x79   :  { %553 = vmatprep.subr.bf16.mxu0 %v726_v0 }
  0x7c   :  { %554 = vmatpush3.bf16.msra.mxu0 %v594_v23 }
  0x7d   :  { %555 = vmatprep.subr.bf16.mxu0 %v726_v0 }
  0x80   :  { %556 = vmatpush3.bf16.msra.mxu0 %v595_v24 }
  0x81   :  { %557 = vmatprep.subr.bf16.mxu0 %v726_v0 }
  0x84   :  { %558 = vmatpush3.bf16.msra.mxu0 %v596_v33 }
  0x85   :  { %559 = vmatprep.subr.bf16.mxu0 %v726_v0 }
  0x88   :  { %560 = vmatpush3.bf16.msra.mxu0 %v597_v34 }
 0x13e   :  { %v188_v26 = vpop.f32.mrb[0].mxu0 }
 0x13f   :  { %v189_v27 = vadd.f32 %v451_v25, %v188_v26  ;;  %v523_v28 = vpop.f32.mrb[1].mxu0 }
 0x140   :  { %v191_v29 = vpop.f32.mrb[2].mxu0 }
 0x141   :  { %v194_v30 = vmax.f32 %v189_v27, 0.0  ;;  %v524_v31 = vpop.f32.mrb[3].mxu0 }
 0x143   :  { %v212_v32 = vpack.c.bf16 %v194_v30, %v194_v30 }
 0x145   :  { %542 = vmatmul.mubr.bf16.vlgmr.msra.gmra.mrb[0].mxu1 %v212_v32 }
 0x218   :  { %v301_v36 = vpop.f32.mrb[0].mxu1 }
 0x219   :  { %v302_v37 = vadd.f32 %v460_v35, %v301_v36  ;;  %v543_v38 = vpop.f32.mrb[1].mxu1 }
 0x21a   :  { %v304_v39 = vpop.f32.mrb[2].mxu1 }
 0x21b   :  { %v307_v40 = vmax.f32 %v302_v37, 0.0  ;;  %v544_v41 = vpop.f32.mrb[3].mxu1 }
 0x21d   :  { %v325_v42 = vpack.c.bf16 %v307_v40, %v307_v40 }
 0x21f   :  { %562 = vmatmul.mubr.bf16.vlgmr.msra.gmra.mrb[4].mxu0 %v325_v42 }
 0x2f2   :  { %v414_v46 = vpop.f32.mrb[4].mxu0 }
 0x2f3   :  { %v415_v47 = vadd.f32 %v469_v45, %v414_v46  ;;  %v563_v48 = vpop.f32.mrb[5].mxu0 }
 0x2f4   :  { %v417_v49 = vpop.f32.mrb[6].mxu0 }
 0x2f5   :  { %v564_v50 = vpop.f32.mrb[7].mxu0  ;;  %v423_v51 = vsel %vm422_vm1, %v415_v47, -1e+30 }
 0x2f6   :  { %424 = vmax.xlane.f32.xlu0 %v423_v51 }
 0x383   :  { %v425_v52 = vpop.xlane.xlu0 %424 }
 0x384   :  { %v426_v53 = vsub.f32 %v423_v51, %v425_v52 }
 0x386   :  { %v427_v54 = vmul.f32 1.442695, %v426_v53 }
 0x388   :  { %598 = vpow2.f32 %v427_v54 }
 0x392   :  { %v599_v55 = vpop.eup %598 }
 0x393   :  { %429 = vadd.xlane.f32.xlu0 %v599_v55 }
 0x420   :  { %v430_v56 = vpop.xlane.xlu0 %429 }
 0x421   :  { %600 = vrcp.f32 %v430_v56 }
 0x42b   :  { %v601_v57 = vpop.eup %600 }
 0x42c   :  { %v432_v58 = vmul.f32 %v601_v57, %v599_v55 }
 0x42e   :  { %433 = vst [vmem:[#allocation10] sm:$0xff] %v432_v58 }
 0x42f   :  { %701 = shalt.err (!%p698_p8)
}
 0x430   :  { %s702_s8 = scalar_lea.hbm %s884_s7, 128 }
 0x431   :  { %p703_p9 = scmp.ne.s32.totalorder %s884_s7, %s702_s8  ;;  %p706_p10 = scmp.lt.u32.totalorder %s702_s8, %s884_s7 }
 0x433   :  { %p708_p11 = pnand %p706_p10, %p703_p9 }
 0x435   :  { %711 = shalt.err (!%p708_p11)
}
 0x436   :  { %443 = dma.vmem_to_hbm [thread:$0]  %s441_s28, 128, %s884_s7, [#allocation4]  }
 0x437   :  { %718 = dma.done.wait [#allocation4], 128  }
 0x438   :  { %719 = vsyncadd [#allocation4], 4294967168 }
 0x439   :  { %447 = vsyncpa [#allocation3], 1 }
 0x43a   :  { %448 = vsyncpa [#allocation6], 1 }
 0x43b   :  { %449 = vsyncpa [#allocation9], 1 }
 0x43c   :  { %450 = vsyncpa [#allocation4], 1 }

// kernel: tpu_custom_call.1
= control target key start
LH: loop header
LB: loop body
LE: loop exit
PB: predicated region body
PF: predicated region fallthrough
CT: control target
= control target key end

     0   :  { %12 = vsyncpa [#allocation3], 0  ;;  %s877_s0 = inlined_call_operand.hbm [shape: f32[8,128], index: 0, kind: input, shape index: {}]   ;;  %s878_s1 = inlined_call_operand.hbm [shape: bf16[128,128], index: 1, kind: input, shape index: {}]   ;;  %s879_s2 = inlined_call_operand.vmem [shape: f32[1,128], index: 2, kind: input, shape index: {}]   ;;  %s880_s3 = inlined_call_operand.hbm [shape: bf16[128,128], index: 3, kind: input, shape index: {}]   ;;  %s881_s4 = inlined_call_operand.vmem [shape: f32[1,128], index: 4, kind: input, shape index: {}]   ;;  %s882_s5 = inlined_call_operand.hbm [shape: bf16[128,128], index: 5, kind: input, shape index: {}]   ;;  %s883_s6 = inlined_call_operand.vmem [shape: f32[1,128], index: 6, kind: input, shape index: {}]   ;;  %s884_s7 = inlined_call_operand.hbm [shape: f32[8,128], index: 7, kind: output, shape index: {}]  }
   0x1   :  { %13 = vsyncpa [#allocation6], 0 }
   0x2   :  { %14 = vsyncpa [#allocation9], 0 }
   0x3   :  { %15 = vsyncpa [#allocation4], 0  ;;  %s720_s24 = smov [#allocation5]   ;;  %s602_s28 = scalar_lea.hbm %s878_s1, 1024 }
   0x4   :  { %s31_s25 = sshll.u32 %s720_s24, 4  ;;  %p603_p0 = scmp.ne.s32.totalorder %s878_s1, %s602_s28  ;;  %s32_s25 = int_to_ptr.vmem [resolvable:$true] %s31_s25 }
   0x5   :  { %p606_p1 = scmp.lt.u32.totalorder %s602_s28, %s878_s1 }
   0x7   :  { %p608_p2 = pnand %p606_p1, %p603_p0 }
   0x9   :  { %611 = shalt.err (!%p608_p2)
}
   0xa   :  { %s612_s10 = scalar_lea.vmem %s32_s25, 1024  ;;  %p617_p4 = scmp.lt.s32.totalorder %s32_s25, %s32_s25 }
   0xb   :  { %p613_p3 = scmp.ne.s32.totalorder %s32_s25, %s612_s10  ;;  %p618_p5 = scmp.lt.s32.totalorder %s612_s10, %s612_s10 }
   0xd   :  { %p619_p6 = por %p618_p5, %p617_p4 }
   0xf   :  { %p620_p7 = pnand %p619_p6, %p613_p3 }
  0x11   :  { %623 = shalt.err (!%p620_p7)
}
  0x12   :  { %s721_s11 = smov 64   ;;  %s722_s12 = smov 4  }
  0x13   :  { %37 = dma.hbm_to_vmem [thread:$0]  %s878_s1, 1024, %s32_s25, [#allocation6], %s721_s11, %s721_s11, %s722_s12  }
  0x14   :  { %s723_s15 = smov [#allocation2]   ;;  %s724_s17 = smov [#allocation7]  }
  0x15   :  { %s22_s16 = sshll.u32 %s723_s15, 4  ;;  %s45_s18 = sshll.u32 %s724_s17, 4  ;;  %s23_s16 = int_to_ptr.vmem [resolvable:$true] %s22_s16  ;;  %s46_s18 = int_to_ptr.vmem [resolvable:$true] %s45_s18 }
  0x16   :  { %s624_s21 = scalar_lea.hbm %s877_s0, 128 }
  0x17   :  { %p625_p8 = scmp.ne.s32.totalorder %s877_s0, %s624_s21  ;;  %p628_p9 = scmp.lt.u32.totalorder %s624_s21, %s877_s0 }
  0x19   :  { %p630_p10 = pnand %p628_p9, %p625_p8 }
  0x1b   :  { %633 = shalt.err (!%p630_p10)
}
  0x1c   :  { %s634_s1 = scalar_lea.vmem %s23_s16, 128  ;;  %p639_p12 = scmp.lt.s32.totalorder %s23_s16, %s23_s16 }
  0x1d   :  { %p635_p11 = scmp.ne.s32.totalorder %s23_s16, %s634_s1  ;;  %p640_p13 = scmp.lt.s32.totalorder %s634_s1, %s634_s1 }
  0x1f   :  { %p641_p0 = por %p640_p13, %p639_p12 }
  0x21   :  { %p642_p1 = pnand %p641_p0, %p635_p11 }
  0x23   :  { %645 = shalt.err (!%p642_p1)
}
  0x24   :  { %25 = dma.hbm_to_vmem [thread:$0]  %s877_s0, 128, %s23_s16, [#allocation3]  }
  0x25   :  { %s646_s30 = scalar_lea.hbm %s880_s3, 1024 }
  0x26   :  { %p647_p2 = scmp.ne.s32.totalorder %s880_s3, %s646_s30  ;;  %p650_p3 = scmp.lt.u32.totalorder %s646_s30, %s880_s3 }
  0x28   :  { %p652_p4 = pnand %p650_p3, %p647_p2 }
  0x2a   :  { %655 = shalt.err (!%p652_p4)
}
  0x2b   :  { %s656_s14 = scalar_lea.vmem %s46_s18, 1024  ;;  %p661_p6 = scmp.lt.s32.totalorder %s46_s18, %s46_s18 }
  0x2c   :  { %p657_p5 = scmp.ne.s32.totalorder %s46_s18, %s656_s14  ;;  %p662_p7 = scmp.lt.s32.totalorder %s656_s14, %s656_s14 }
  0x2e   :  { %p663_p8 = por %p662_p7, %p661_p6 }
  0x30   :  { %p664_p9 = pnand %p663_p8, %p657_p5 }
  0x32   :  { %667 = shalt.err (!%p664_p9)
}
  0x33   :  { %51 = dma.hbm_to_vmem [thread:$0]  %s880_s3, 1024, %s46_s18, [#allocation6], %s721_s11, %s721_s11, %s722_s12  }
  0x34   :  { %s725_s16 = smov [#allocation8]   ;;  %s668_s21 = scalar_lea.hbm %s882_s5, 1024 }
  0x35   :  { %s59_s17 = sshll.u32 %s725_s16, 4  ;;  %p669_p10 = scmp.ne.s32.totalorder %s882_s5, %s668_s21  ;;  %s60_s17 = int_to_ptr.vmem [resolvable:$true] %s59_s17 }
  0x36   :  { %p672_p11 = scmp.lt.u32.totalorder %s668_s21, %s882_s5 }
  0x38   :  { %p674_p12 = pnand %p672_p11, %p669_p10 }
  0x3a   :  { %677 = shalt.err (!%p674_p12)
}
  0x3b   :  { %s678_s1 = scalar_lea.vmem %s60_s17, 1024  ;;  %p683_p0 = scmp.lt.s32.totalorder %s60_s17, %s60_s17 }
  0x3c   :  { %p679_p13 = scmp.ne.s32.totalorder %s60_s17, %s678_s1  ;;  %p684_p1 = scmp.lt.s32.totalorder %s678_s1, %s678_s1 }
  0x3e   :  { %p685_p2 = por %p684_p1, %p683_p0 }
  0x40   :  { %p686_p3 = pnand %p685_p2, %p679_p13 }
  0x42   :  { %689 = shalt.err (!%p686_p3)
}
  0x43   :  { %65 = dma.hbm_to_vmem [thread:$0]  %s882_s5, 1024, %s60_s17, [#allocation9], %s721_s11, %s721_s11, %s722_s12  }
  0x44   :  { %712 = dma.done.wait [#allocation3], 128  }
  0x45   :  { %713 = vsyncadd [#allocation3], 4294967168 }
  0x46   :  { %714 = dma.done.wait [#allocation6], 2048  }
  0x47   :  { %715 = vsyncadd [#allocation6], 4294965248 }
  0x48   :  { %716 = dma.done.wait [#allocation9], 1024  }
  0x49   :  { %717 = vsyncadd [#allocation9], 4294966272  ;;  %v726_v0 = vmov 0.0   ;;  %vm727_vm0 = vmmov 0   ;;  %v574_v1 = vld [vmem:[#allocation5] sm:$0xff]   ;;  %v575_v2 = vld [vmem:[#allocation5 + $0x8] sm:$0xff]   ;;  %v420_v43 = vlaneseq }
  0x4a   :  { %505 = vmatprep.subr.bf16.mxu0 %v726_v0  ;;  %521 = vmatprep.mubr.msk.bf16.mxu0 %vm727_vm0, %v726_v0  ;;  %v576_v3 = vld [vmem:[#allocation5 + $0x10] sm:$0xff]   ;;  %v582_v4 = vld [vmem:[#allocation7] sm:$0xff]   ;;  %v577_v5 = vld [vmem:[#allocation5 + $0x18] sm:$0xff]  }
  0x4b   :  { %525 = vmatprep.subr.bf16.mxu1 %v726_v0  ;;  %541 = vmatprep.mubr.msk.bf16.mxu1 %vm727_vm0, %v726_v0  ;;  %v583_v6 = vld [vmem:[#allocation7 + $0x8] sm:$0xff]   ;;  %v578_v7 = vld [vmem:[#allocation5 + $0x20] sm:$0xff]   ;;  %v584_v8 = vld [vmem:[#allocation7 + $0x10] sm:$0xff]   ;;  %v421_v44 = vand.u32 127, %v420_v43 }
  0x4c   :  { %506 = vmatpush3.bf16.msra.mxu0 %v574_v1  ;;  %526 = vmatpush3.bf16.msra.mxu1 %v582_v4  ;;  %v579_v9 = vld [vmem:[#allocation5 + $0x28] sm:$0xff]   ;;  %v585_v10 = vld [vmem:[#allocation7 + $0x18] sm:$0xff]   ;;  %v580_v11 = vld [vmem:[#allocation5 + $0x30] sm:$0xff]  }
  0x4d   :  { %507 = vmatprep.subr.bf16.mxu0 %v726_v0  ;;  %527 = vmatprep.subr.bf16.mxu1 %v726_v0  ;;  %v586_v12 = vld [vmem:[#allocation7 + $0x20] sm:$0xff]   ;;  %v581_v13 = vld [vmem:[#allocation5 + $0x38] sm:$0xff]   ;;  %v587_v15 = vld [vmem:[#allocation7 + $0x28] sm:$0xff]   ;;  %vm422_vm1 = vcmp.lt.s32.totalorder %v421_v44, 16 }
  0x4e   :  { %v81_v14 = vld [vmem:[#allocation2] sm:$0xff]  ;;  %v588_v17 = vld [vmem:[#allocation7 + $0x30] sm:$0xff]   ;;  %v590_v19 = vld [vmem:[#allocation8] sm:$0xff]  }
  0x4f   :  { %v99_v16 = vpack.c.bf16 %v81_v14, %v81_v14  ;;  %v589_v18 = vld [vmem:[#allocation7 + $0x38] sm:$0xff]   ;;  %v591_v20 = vld [vmem:[#allocation8 + $0x8] sm:$0xff]   ;;  %v592_v21 = vld [vmem:[#allocation8 + $0x10] sm:$0xff]  }
  0x50   :  { %508 = vmatpush3.bf16.msra.mxu0 %v575_v2  ;;  %528 = vmatpush3.bf16.msra.mxu1 %v583_v6  ;;  %v593_v22 = vld [vmem:[#allocation8 + $0x18] sm:$0xff]   ;;  %v594_v23 = vld [vmem:[#allocation8 + $0x20] sm:$0xff]   ;;  %v595_v24 = vld [vmem:[#allocation8 + $0x28] sm:$0xff]  }
  0x51   :  { %509 = vmatprep.subr.bf16.mxu0 %v726_v0  ;;  %529 = vmatprep.subr.bf16.mxu1 %v726_v0  ;;  %v451_v25 = vld [vmem:[%s879_s2] ss:$0 sm:$0xff]  ;;  %v596_v33 = vld [vmem:[#allocation8 + $0x30] sm:$0xff]  }
  0x52   :  { %v597_v34 = vld [vmem:[#allocation8 + $0x38] sm:$0xff]  }
  0x53   :  { %v460_v35 = vld [vmem:[%s881_s4] ss:$0 sm:$0xff]  ;;  %s728_s4 = smov [#allocation10]  }
  0x54   :  { %510 = vmatpush3.bf16.msra.mxu0 %v576_v3  ;;  %530 = vmatpush3.bf16.msra.mxu1 %v584_v8  ;;  %v469_v45 = vld [vmem:[%s883_s6] ss:$0 sm:$0xff]  ;;  %s440_s28 = sshll.u32 %s728_s4, 4  ;;  %s441_s28 = int_to_ptr.vmem [resolvable:$true] %s440_s28 }
  0x55   :  { %511 = vmatprep.subr.bf16.mxu0 %v726_v0  ;;  %531 = vmatprep.subr.bf16.mxu1 %v726_v0  ;;  %s690_s6 = scalar_lea.vmem %s441_s28, 128  ;;  %p695_p5 = scmp.lt.s32.totalorder %s441_s28, %s441_s28 }
  0x56   :  { %p691_p4 = scmp.ne.s32.totalorder %s441_s28, %s690_s6  ;;  %p696_p6 = scmp.lt.s32.totalorder %s690_s6, %s690_s6 }
  0x58   :  { %512 = vmatpush3.bf16.msra.mxu0 %v577_v5  ;;  %532 = vmatpush3.bf16.msra.mxu1 %v585_v10  ;;  %p697_p7 = por %p696_p6, %p695_p5 }
  0x59   :  { %513 = vmatprep.subr.bf16.mxu0 %v726_v0  ;;  %533 = vmatprep.subr.bf16.mxu1 %v726_v0 }
  0x5a   :  { %p698_p8 = pnand %p697_p7, %p691_p4 }
  0x5c   :  { %514 = vmatpush3.bf16.msra.mxu0 %v578_v7  ;;  %534 = vmatpush3.bf16.msra.mxu1 %v586_v12 }
  0x5d   :  { %515 = vmatprep.subr.bf16.mxu0 %v726_v0  ;;  %535 = vmatprep.subr.bf16.mxu1 %v726_v0 }
  0x60   :  { %516 = vmatpush3.bf16.msra.mxu0 %v579_v9  ;;  %536 = vmatpush3.bf16.msra.mxu1 %v587_v15 }
  0x61   :  { %517 = vmatprep.subr.bf16.mxu0 %v726_v0  ;;  %537 = vmatprep.subr.bf16.mxu1 %v726_v0 }
  0x64   :  { %518 = vmatpush3.bf16.msra.mxu0 %v580_v11  ;;  %538 = vmatpush3.bf16.msra.mxu1 %v588_v17 }
  0x65   :  { %519 = vmatprep.subr.bf16.mxu0 %v726_v0  ;;  %539 = vmatprep.subr.bf16.mxu1 %v726_v0 }
  0x68   :  { %520 = vmatpush3.bf16.msra.mxu0 %v581_v13  ;;  %540 = vmatpush3.bf16.msra.mxu1 %v589_v18 }
  0x69   :  { %545 = vmatprep.subr.bf16.mxu0 %v726_v0 }
  0x6b   :  { %522 = vmatmul.mubr.bf16.vlgmr.msra.gmra.mrb[0].mxu0 %v99_v16 }
  0x6c   :  { %561 = vmatprep.mubr.msk.bf16.mxu0 %vm727_vm0, %v726_v0  ;;  %546 = vmatpush3.bf16.msra.mxu0 %v590_v19 }
  0x6d   :  { %547 = vmatprep.subr.bf16.mxu0 %v726_v0 }
  0x70   :  { %548 = vmatpush3.bf16.msra.mxu0 %v591_v20 }
  0x71   :  { %549 = vmatprep.subr.bf16.mxu0 %v726_v0 }
  0x74   :  { %550 = vmatpush3.bf16.msra.mxu0 %v592_v21 }
  0x75   :  { %551 = vmatprep.subr.bf16.mxu0 %v726_v0 }
  0x78   :  { %552 = vmatpush3.bf16.msra.mxu0 %v593_v22 }
  0x79   :  { %553 = vmatprep.subr.bf16.mxu0 %v726_v0 }
  0x7c   :  { %554 = vmatpush3.bf16.msra.mxu0 %v594_v23 }
  0x7d   :  { %555 = vmatprep.subr.bf16.mxu0 %v726_v0 }
  0x80   :  { %556 = vmatpush3.bf16.msra.mxu0 %v595_v24 }
  0x81   :  { %557 = vmatprep.subr.bf16.mxu0 %v726_v0 }
  0x84   :  { %558 = vmatpush3.bf16.msra.mxu0 %v596_v33 }
  0x85   :  { %559 = vmatprep.subr.bf16.mxu0 %v726_v0 }
  0x88   :  { %560 = vmatpush3.bf16.msra.mxu0 %v597_v34 }
 0x13e   :  { %v188_v26 = vpop.f32.mrb[0].mxu0 }
 0x13f   :  { %v189_v27 = vadd.f32 %v451_v25, %v188_v26  ;;  %v523_v28 = vpop.f32.mrb[1].mxu0 }
 0x140   :  { %v191_v29 = vpop.f32.mrb[2].mxu0 }
 0x141   :  { %v194_v30 = vmax.f32 %v189_v27, 0.0  ;;  %v524_v31 = vpop.f32.mrb[3].mxu0 }
 0x143   :  { %v212_v32 = vpack.c.bf16 %v194_v30, %v194_v30 }
 0x145   :  { %542 = vmatmul.mubr.bf16.vlgmr.msra.gmra.mrb[0].mxu1 %v212_v32 }
 0x218   :  { %v301_v36 = vpop.f32.mrb[0].mxu1 }
 0x219   :  { %v302_v37 = vadd.f32 %v460_v35, %v301_v36  ;;  %v543_v38 = vpop.f32.mrb[1].mxu1 }
 0x21a   :  { %v304_v39 = vpop.f32.mrb[2].mxu1 }
 0x21b   :  { %v307_v40 = vmax.f32 %v302_v37, 0.0  ;;  %v544_v41 = vpop.f32.mrb[3].mxu1 }
 0x21d   :  { %v325_v42 = vpack.c.bf16 %v307_v40, %v307_v40 }
 0x21f   :  { %562 = vmatmul.mubr.bf16.vlgmr.msra.gmra.mrb[4].mxu0 %v325_v42 }
 0x2f2   :  { %v414_v46 = vpop.f32.mrb[4].mxu0 }
 0x2f3   :  { %v415_v47 = vadd.f32 %v469_v45, %v414_v46  ;;  %v563_v48 = vpop.f32.mrb[5].mxu0 }
 0x2f4   :  { %v417_v49 = vpop.f32.mrb[6].mxu0 }
 0x2f5   :  { %v564_v50 = vpop.f32.mrb[7].mxu0  ;;  %v423_v51 = vsel %vm422_vm1, %v415_v47, -1e+30 }
 0x2f6   :  { %424 = vmax.xlane.f32.xlu0 %v423_v51 }
 0x383   :  { %v425_v52 = vpop.xlane.xlu0 %424 }
 0x384   :  { %v426_v53 = vsub.f32 %v423_v51, %v425_v52 }
 0x386   :  { %v427_v54 = vmul.f32 1.442695, %v426_v53 }
 0x388   :  { %598 = vpow2.f32 %v427_v54 }
 0x392   :  { %v599_v55 = vpop.eup %598 }
 0x393   :  { %429 = vadd.xlane.f32.xlu0 %v599_v55 }
 0x420   :  { %v430_v56 = vpop.xlane.xlu0 %429 }
 0x421   :  { %600 = vrcp.f32 %v430_v56 }
 0x42b   :  { %v601_v57 = vpop.eup %600 }
 0x42c   :  { %v432_v58 = vmul.f32 %v601_v57, %v599_v55 }
 0x42e   :  { %433 = vst [vmem:[#allocation10] sm:$0xff] %v432_v58 }
 0x42f   :  { %701 = shalt.err (!%p698_p8)
}
 0x430   :  { %s702_s8 = scalar_lea.hbm %s884_s7, 128 }
 0x431   :  { %p703_p9 = scmp.ne.s32.totalorder %s884_s7, %s702_s8  ;;  %p706_p10 = scmp.lt.u32.totalorder %s702_s8, %s884_s7 }
 0x433   :  { %p708_p11 = pnand %p706_p10, %p703_p9 }
 0x435   :  { %711 = shalt.err (!%p708_p11)
}
 0x436   :  { %443 = dma.vmem_to_hbm [thread:$0]  %s441_s28, 128, %s884_s7, [#allocation4]  }
 0x437   :  { %718 = dma.done.wait [#allocation4], 128  }
 0x438   :  { %719 = vsyncadd [#allocation4], 4294967168 }
 0x439   :  { %447 = vsyncpa [#allocation3], 1 }
 0x43a   :  { %448 = vsyncpa [#allocation6], 1 }
 0x43b   :  { %449 = vsyncpa [#allocation9], 1 }
 0x43c   :  { %450 = vsyncpa [#allocation4], 1 }

</bundles_post_ra>
